<compile_context>
chip_gen: v5e
topology: v5e:2x2
jax: 0.10.0
libtpu: 0.0.40
codegen_flags: <defaults>
</compile_context>

<pallas_src>
import functools
import math

import jax
import jax.numpy as jnp
from jax.experimental import pallas as pl
from jax.experimental.pallas import tpu as pltpu


_PE_STEP_ROWS = 8  # sublane-aligned pe_table block used by the decode path


def _make_pe_table(max_len: int, dim: int) -> jnp.ndarray:
    """Build the (max_len, dim) sinusoidal table exactly like the torch code."""
    if dim % 2 != 0:
        raise ValueError(
            f"Cannot use sin/cos positional encoding with odd dim (got dim={dim})")
    position = jnp.arange(0, max_len, dtype=jnp.float32)[:, None]          # (L, 1)
    div_term = jnp.exp(
        jnp.arange(0, dim, 2, dtype=jnp.float32) * -(math.log(10000.0) / dim)
    )                                                                       # (dim/2,)
    angles = position * div_term                                            # (L, dim/2)
    pe = jnp.zeros((max_len, dim), dtype=jnp.float32)
    pe = pe.at[:, 0::2].set(jnp.sin(angles))
    pe = pe.at[:, 1::2].set(jnp.cos(angles))
    return pe


# ----------------------------------------------------------------------------
# Kernels
# ----------------------------------------------------------------------------

def _pe_light_kernel(emb_ref, pe_ref, out_ref, *, scale, batch, compute_dtype):
    """emb/out: (ts, batch*dim); pe: (ts, dim) with dim % 128 == 0."""
    pe = pe_ref[...].astype(compute_dtype)
    if batch > 1:
        # dim is 128-aligned -> whole-vreg lane copies, not an XLU relayout.
        pe = jnp.concatenate([pe] * batch, axis=-1)
    out_ref[...] = (emb_ref[...] * scale + pe).astype(out_ref.dtype)


def _slab_kernel(emb_ref, pe_ref, out_ref, *, scale):
    """Pure elementwise stream: emb/pe/out all (ts, W), W lane-dense."""
    out_ref[...] = (emb_ref[...] * scale + pe_ref[...]).astype(out_ref.dtype)


def _step_kernel(step_ref, emb_ref, pe_ref, out_ref, *, scale, batch):
    """Decode path: emb/out (1, batch*dim); pe: 8-row block containing `step`."""
    row = step_ref[0] % _PE_STEP_ROWS
    pe = pe_ref[pl.ds(row, 1), :].astype(jnp.float32)            # (1, dim)
    if batch > 1:
        pe = jnp.concatenate([pe] * batch, axis=-1)              # (1, batch*dim)
    out_ref[...] = (emb_ref[...].astype(jnp.float32) * scale + pe).astype(out_ref.dtype)


# ----------------------------------------------------------------------------
# Sizing helpers
# ----------------------------------------------------------------------------

def _vmem_budget_bytes():
    """3/4 of physical VMEM (v5e/v6e: 96 MiB, v7x: 48 MiB); None if unknown."""
    try:
        cap = int(pltpu.get_tpu_info().vmem_capacity_bytes)
        return min((cap * 3) // 4, 96 << 20)
    except Exception:
        return None


def _choose_rows(rows: int, row_bytes: int, target_block_bytes: int) -> int:
    """Row-tile: ~target_block_bytes per emb block, sublane aligned, >=2 grid steps."""
    ts = max(1, target_block_bytes // max(row_bytes, 1))
    ts = min(ts, rows)
    if ts < rows:
        ts = min(max(8, (ts // 8) * 8), rows)
    # Keep at least 2 grid steps so both v7x TensorCores get work.
    if rows >= 16:
        ts = min(ts, max(8, ((rows // 2) // 8) * 8))
    return ts


def _pick_lane_width(n: int, cap: int = 8192):
    """Largest W | n, W % 128 == 0, W <= min(cap, n/16-ish); None if 128 !| n."""
    if n % 128 != 0:
        return None
    limit = min(cap, max(128, n // 16))
    best = None
    w = 128
    while w <= limit:
        if n % w == 0:
            best = w
        w += 128
    return best


# ----------------------------------------------------------------------------
# Wrapper
# ----------------------------------------------------------------------------

def positional_encoding(emb: jnp.ndarray,
                        pe_table: jnp.ndarray,
                        dim: int,
                        step=None,
                        *,
                        target_block_bytes=None) -> jnp.ndarray:
    """emb: (seq_len, batch, dim).  Returns emb * sqrt(dim) + pe, same shape/dtype."""
    seq_len, batch, d = emb.shape
    if d != dim:
        raise ValueError(f"embedding dim {d} != module dim {dim}")
    max_len = pe_table.shape[0]
    scale = math.sqrt(dim)
    cols = batch * dim
    compute_dtype = jnp.bfloat16 if emb.dtype == jnp.bfloat16 else jnp.float32

    vmem_budget = _vmem_budget_bytes()
    if target_block_bytes is None:
        # Per-block footprint ~ 2x(in) + 2x(out) + pe + compute temporaries
        # ~= 6-7x the block target, so budget/8 stays under the explicit limit.
        target_block_bytes = (min(8 << 20, max(1 << 20, vmem_budget // 8))
                              if vmem_budget else 2 << 20)
    cp_kwargs = dict(dimension_semantics=("parallel",))
    if vmem_budget is not None:
        cp_kwargs["vmem_limit_bytes"] = vmem_budget
    compiler_params = pltpu.CompilerParams(**cp_kwargs)

    # ---------------- stepwise decode path ----------------
    if step is not None:
        if seq_len != 1:
            raise ValueError("stepwise positional encoding expects seq_len == 1")
        if isinstance(step, int) and not 0 <= step < max_len:
            raise ValueError(f"step {step} out of range for max_len {max_len}")
        step_arr = jnp.asarray([step], dtype=jnp.int32)
        emb2d = emb.reshape(1, cols)
        kernel = functools.partial(_step_kernel, scale=scale, batch=batch)
        out2d = pl.pallas_call(
            kernel,
            out_shape=jax.ShapeDtypeStruct((1, cols), emb.dtype),
            grid_spec=pltpu.PrefetchScalarGridSpec(
                num_scalar_prefetch=1,          # `step` lands in SMEM, drives pe index_map
                grid=(1,),
                in_specs=[
                    pl.BlockSpec((1, cols), lambda i, s: (0, 0)),
                    pl.BlockSpec((_PE_STEP_ROWS, dim),
                                 lambda i, s: (s[0] // _PE_STEP_ROWS, 0)),
                ],
                out_specs=pl.BlockSpec((1, cols), lambda i, s: (0, 0)),
            ),
            compiler_params=compiler_params,
            # arg 0 is the scalar-prefetch step array; emb2d is arg 1.
            input_output_aliases={1: 0},
        )(step_arr, emb2d, pe_table)
        return out2d.reshape(1, batch, dim)

    # ---------------- full-sequence path ----------------
    if seq_len > max_len:
        raise ValueError(f"seq_len {seq_len} exceeds pe table max_len {max_len}")

    if dim % 128 == 0 and seq_len >= 8:
        # pe streamed at 1/batch of emb traffic, broadcast in-kernel (whole vregs).
        emb2d = emb.reshape(seq_len, cols)
        ts = _choose_rows(seq_len, cols * emb2d.dtype.itemsize, target_block_bytes)
        if ts % 8 != 0:            # pe block (ts, dim) must be sublane aligned
            ts = max(8, (ts // 8) * 8)
        kernel = functools.partial(_pe_light_kernel, scale=scale, batch=batch,
                                   compute_dtype=compute_dtype)
        out2d = pl.pallas_call(
            kernel,
            out_shape=jax.ShapeDtypeStruct((seq_len, cols), emb.dtype),
            grid_spec=pltpu.PrefetchScalarGridSpec(
                num_scalar_prefetch=0,
                grid=(pl.cdiv(seq_len, ts),),
                in_specs=[
                    pl.BlockSpec((ts, cols), lambda i: (i, 0)),   # emb stream
                    pl.BlockSpec((ts, dim), lambda i: (i, 0)),    # pe_table (whole, unsliced)
                ],
                out_specs=pl.BlockSpec((ts, cols), lambda i: (i, 0)),
            ),
            compiler_params=compiler_params,
            input_output_aliases={0: 0},        # emb block read and overwritten in place
        )(emb2d, pe_table)
        return out2d.reshape(seq_len, batch, dim)

    # Small / non-128-aligned dim: build the batch-broadcast pe slab once in the
    # wrapper (in compute dtype) and present both operands as a lane-dense
    # (rows, W) slab so the kernel does full-width unmasked stores.
    pe_slab = jnp.broadcast_to(
        pe_table[:seq_len].astype(compute_dtype)[:, None, :], (seq_len, batch, dim))
    n = seq_len * cols
    w = cols if cols % 128 == 0 else _pick_lane_width(n)
    if w is None:
        w = cols       # total size not 128-divisible: fall back to masked stores
    rows = n // w
    emb2d = emb.reshape(rows, w)
    pe2d = pe_slab.reshape(rows, w)
    ts = _choose_rows(rows, w * emb2d.dtype.itemsize, target_block_bytes)
    kernel = functools.partial(_slab_kernel, scale=scale)
    out2d = pl.pallas_call(
        kernel,
        out_shape=jax.ShapeDtypeStruct((rows, w), emb.dtype),
        grid_spec=pltpu.PrefetchScalarGridSpec(
            num_scalar_prefetch=0,
            grid=(pl.cdiv(rows, ts),),
            in_specs=[
                pl.BlockSpec((ts, w), lambda i: (i, 0)),
                pl.BlockSpec((ts, w), lambda i: (i, 0)),
            ],
            out_specs=pl.BlockSpec((ts, w), lambda i: (i, 0)),
        ),
        compiler_params=compiler_params,
        input_output_aliases={0: 0},
    )(emb2d, pe2d)
    return out2d.reshape(seq_len, batch, dim)


# ----------------------------------------------------------------------------
# Self-test
# ----------------------------------------------------------------------------

if __name__ == "__main__":
    # Module config (dropout=0.0 -> identity), small shapes
    dim = 32
    max_len = 64
    seq_len, batch = 64, 2

    pe_table = _make_pe_table(max_len, dim)

    key = jax.random.PRNGKey(0)
    emb = jax.random.normal(key, (seq_len, batch, dim), dtype=jnp.float32)

    # --- full-sequence, small dim (lane-dense slab path, multi-block grid) ---
    out = jax.block_until_ready(positional_encoding(emb, pe_table, dim, step=None))
    ref = emb * math.sqrt(dim) + pe_table[:seq_len][:, None, :]
    assert jnp.allclose(out, ref, atol=1e-4, rtol=1e-5), "mismatch vs reference (slab path)"

    # --- full-sequence, dim % 128 == 0 (pe-light streaming path) ---
    dim2, max_len2 = 128, 128
    pe_table2 = _make_pe_table(max_len2, dim2)
    emb2 = jax.random.normal(jax.random.PRNGKey(1), (seq_len, batch, dim2),
                             dtype=jnp.float32)
    out2 = jax.block_until_ready(positional_encoding(emb2, pe_table2, dim2, step=None))
    ref2 = emb2 * math.sqrt(dim2) + pe_table2[:seq_len][:, None, :]
    assert jnp.allclose(out2, ref2, atol=1e-4, rtol=1e-5), "mismatch vs reference (pe-light path)"

    # --- bf16 streaming path (bf16 compute, halves HBM + VMEM intermediates) ---
    emb_bf16 = emb.astype(jnp.bfloat16)
    out_bf16 = jax.block_until_ready(
        positional_encoding(emb_bf16, pe_table, dim, step=None))
    assert out_bf16.dtype == jnp.bfloat16
    assert jnp.allclose(out_bf16.astype(jnp.float32), ref,
                        atol=0.5, rtol=0.02), "mismatch vs reference (bf16)"

    # --- stepwise decode path (seq_len == 1), scalar-prefetch indexed pe ---
    emb1 = emb[:1]
    out1 = jax.block_until_ready(positional_encoding(emb1, pe_table, dim, step=3))
    ref1 = emb1 * math.sqrt(dim) + pe_table[3][None, None, :]
    assert jnp.allclose(out1, ref1, atol=1e-4, rtol=1e-5), "mismatch vs reference (step)"

    print("KERNEL_OK")
</pallas_src>

<mosaic_0001>
module attributes {stable_mosaic.version = 11 : i64} {
  func.func @_slab_kernel(%arg0: i32, %arg1: memref<8x256xf32, #tpu.memory_space<vmem>>, %arg2: memref<8x256xf32, #tpu.memory_space<vmem>>, %arg3: memref<8x256xf32, #tpu.memory_space<vmem>>) attributes {dimension_semantics = [#tpu.dimension_semantics<parallel>], iteration_bounds = array<i64: 2>, scalar_prefetch = 0 : i64, scratch_operands = 0 : i64, tpu.core_type = #tpu.core_type<tc>, window_params = [{transform_indices = @transform_0, window_bounds = array<i64: 8, 256>}, {transform_indices = @transform_1, window_bounds = array<i64: 8, 256>}, {transform_indices = @transform_2, window_bounds = array<i64: 8, 256>}]} {
    %c0 = arith.constant 0 : index
    %c0_0 = arith.constant 0 : index
    %0 = vector.load %arg1[%c0, %c0_0] : memref<8x256xf32, #tpu.memory_space<vmem>>, vector<8x256xf32>
    %cst = arith.constant 5.65685415 : f32
    %1 = vector.broadcast %cst : f32 to vector<8x256xf32>
    %2 = arith.mulf %0, %1 : vector<8x256xf32>
    %c0_1 = arith.constant 0 : index
    %c0_2 = arith.constant 0 : index
    %3 = vector.load %arg2[%c0_1, %c0_2] : memref<8x256xf32, #tpu.memory_space<vmem>>, vector<8x256xf32>
    %4 = arith.addf %2, %3 : vector<8x256xf32>
    %c0_3 = arith.constant 0 : index
    %c0_4 = arith.constant 0 : index
    %5 = vector.load %arg3[%c0_3, %c0_4] : memref<8x256xf32, #tpu.memory_space<vmem>>, vector<8x256xf32>
    tpu.vector_store %arg3[%c0_3, %c0_4], %4 {strides = array<i32>} : memref<8x256xf32, #tpu.memory_space<vmem>>, vector<8x256xf32>,
    return
  }
  func.func @transform_0(%arg0: i32) -> (i32, i32) {
    %c0_i32 = arith.constant 0 : i32
    %c0_i32_0 = arith.constant 0 : i32
    return %arg0, %c0_i32 : i32, i32
  }
  func.func @transform_1(%arg0: i32) -> (i32, i32) {
    %c0_i32 = arith.constant 0 : i32
    %c0_i32_0 = arith.constant 0 : i32
    return %arg0, %c0_i32 : i32, i32
  }
  func.func @transform_2(%arg0: i32) -> (i32, i32) {
    %c0_i32 = arith.constant 0 : i32
    %c0_i32_0 = arith.constant 0 : i32
    return %arg0, %c0_i32 : i32, i32
  }
}

</mosaic_0001>

<bundles_post_ra>
// kernel: tpu_custom_call.1
= control target key start
LH: loop header
LB: loop body
LE: loop exit
PB: predicated region body
PF: predicated region fallthrough
CT: control target
= control target key end

     0   :  { %7 = vsyncpa [#allocation3], 0  ;;  %s601_s0 = inlined_call_operand.hbm [shape: f32[16,256], index: 0, kind: input, shape index: {}, may-alias: {0,2}]   ;;  %s602_s1 = inlined_call_operand.vmem [shape: f32[16,256], index: 1, kind: input, shape index: {}]   ;;  %s603_s2 = inlined_call_operand.hbm [shape: f32[16,256], index: 2, kind: output, shape index: {}, may-alias: {0,2}]  }
   0x1   :  { %9 = vsyncpa [#allocation3 + $0x1], 0 }
   0x2   :  { %10 = vsyncpa [#allocation4], 0 }
   0x3   :  { %12 = vsyncpa [#allocation4 + $0x1], 0  ;;  %s469_s9 = smov 0   ;;  %s471_s10 = smov 0  }
   0x4   :  { %s473_s11 = smov 0   ;;  %s475_s12 = smov 0  }
   0x5 LB: > { %s490_s13 = sadd.s32 4294967295, %s452_s12   ;;  %s291_s14 = sadd.s32 4294967294, %s452_s12   ;;  %s452_s12 = sphi %s475_s12, %s613_s12   ;;  %s448_s11 = sphi %s473_s11, %s612_s11   ;;  %s444_s10 = sphi %s471_s10, %s611_s10   ;;  %s440_s9 = sphi %s469_s9, %s610_s9  }
   0x6   : > { %s494_s15 = sadd.s32 1, %s452_s12   ;;  %s25_s16 = sadd.s32 1, %s448_s11 }
   0x7   : > { %s22_s17 = ssub.s32 %s452_s12, %s494_s15  ;;  %p32_p0 = scmp.ne.s32.totalorder %s448_s11, %s444_s10 }
   0x8   : > { %p23_p1 = scmp.eq.s32.totalorder %s22_s17, 0  ;;  %p33_p2 = scmp.eq.s32.totalorder %s452_s12, 0 }
   0x9   : > { %p38_p3 = scmp.ne.s32.totalorder %s444_s10, %s440_s9  ;;  %p39_p4 = scmp.eq.s32.totalorder %s490_s13, 0 }
   0xa   : > { %s506_s18 = scalar_select %p23_p1, %s448_s11, %s25_s16  }
   0xb   : > { %p508_p5 = por %p33_p2, %p32_p0  ;;  %p512_p6 = por %p39_p4, %p38_p3 }
   0xc   : > { %p88_p7 = scmp.eq.s32.totalorder %s490_s13, 1  ;;  %p94_p8 = scmp.eq.s32.totalorder %s291_s14, 1 }
   0xd   : > { %p322_p10 = scmp.lt.s32.totalorder %s452_s12, 2  ;;  %s114_s23 = sand.u32 1, %s448_s11  }
   0xe   : > { %p519_p11 = por %p88_p7, %p32_p0  ;;  %p523_p12 = por %p94_p8, %p38_p3 }
   0xf   : > { %s307_s24 = sshll.u32 %s452_s12, 4  ;;  %s294_s25 = sshll.u32 %s114_s23, 4 }
  0x10   : > { %s123_s28 = scalar_lea.hbm %s601_s0, %s307_s24  ;;  %s118_s30 = scalar_lea.vmem [#allocation2], %s294_s25 }
  0x11   : > { %s125_s29 = sshll.u32 %s123_s28, 4  ;;  %s127_s3 = sshll.u32 %s118_s30, 4  ;;  %s126_s29 = int_to_ptr.hbm [resolvable:$true] %s125_s29  ;;  %s128_s3 = int_to_ptr.vmem [resolvable:$true] %s127_s3 }
  0x12   : > { %p534_p13 = pnand %p322_p10, %p508_p5  ;;  %p297_p0 = scmp.ge.s32.totalorder %s452_s12, 1 }
  0x13   : > { %p140_p1 = scmp.lt.s32.totalorder %s452_s12, 3  ;;  %s115_s5 = scalar_lea.sflag [#allocation3], %s114_s23 }
  0x14   : > { %s356_s6 = sshra.s32 %s126_s29, 4  ;;  %p360_p3 = pneg %p534_p13  ;;  %s357_s6 = int_to_ptr.hbm [resolvable:$true] %s356_s6 }
  0x15   : > { %s358_s7 = scalar_lea.hbm %s357_s6, 16  ;;  %s363_s16 = scalar_lea.hbm %s601_s0, 32 }
  0x16   : > { %p359_p2 = scmp.ne.s32.totalorder %s357_s6, %s358_s7  ;;  %p364_p5 = scmp.lt.s32.totalorder %s357_s6, %s601_s0 }
  0x17   : > { %p365_p8 = scmp.lt.s32.totalorder %s363_s16, %s358_s7 }
  0x18   : > { %p361_p4 = pnand %p360_p3, %p359_p2 }
  0x19   : > { %p366_p10 = por %p365_p8, %p364_p5 }
  0x1a   : > { %p362_p7 = pneg %p361_p4 }
  0x1c   : > { %p367_p9 = pnand %p366_p10, %p362_p7 }
  0x1e   : > { %370 = shalt.err (!%p367_p9)
}
  0x1f   : > { %317 = dma.hbm_to_vmem [thread:$0]  (!%p534_p13), %s126_s29, 256, %s128_s3, %s115_s5  }
  0x20   : > { %p141_p2 = pnand %p297_p0, %p140_p1 }
  0x21   : > { %s555_s23 = sand.u32 (!%p141_p2), 1, %s444_s10  }
  0x22   : > { %144 = sbr.rel (%p141_p2) target bundleno = 57 (0x39), region = 28  ;;  %s298_s24 = sshll.u32 (!%p141_p2), %s555_s23, 4 }
  0x23   : > { %s147_s25 = scalar_lea.sflag (!%p141_p2), [#allocation3], %s555_s23  ;;  %s150_s26 = scalar_lea.vmem (!%p141_p2), [#allocation2], %s298_s24 }
  0x27   : > { %431 = dma.done.wait (%p512_p6), %s147_s25, 256  }
  0x28   : > { %433 = vsyncadd (%p512_p6), %s147_s25, 4294967040  ;;  %p177_p9 = scmp.lt.s32.totalorder %s490_s13, 1  ;;  %s309_s28 = sshll.u32 %s490_s13, 4  ;;  %v182_v0 = vld [vmem:[%s150_s26] sm:$0xff]  ;;  %v183_v2 = vld [vmem:[%s150_s26 + $0x8] sm:$0xff] }
  0x29   : > { %s204_s7 = scalar_lea.hbm %s603_s2, %s309_s28  ;;  %s176_s20 = scalar_lea.vmem [#allocation5], %s298_s24  ;;  %v184_v3 = vmul.f32 5.656854, %v182_v0  ;;  %v185_v4 = vmul.f32 5.656854, %v183_v2 }
  0x2a   : > { %s178_s27 = scalar_select %p177_p9, %s490_s13, 1 }
  0x2b   : > { %s206_s8 = sshll.u32 %s176_s20, 4  ;;  %s208_s13 = sshll.u32 %s204_s7, 4  ;;  %s207_s8 = int_to_ptr.vmem [resolvable:$true] %s206_s8  ;;  %s209_s13 = int_to_ptr.hbm [resolvable:$true] %s208_s13 }
  0x2c   : > { %s308_s29 = sshll.u32 %s178_s27, 4  ;;  %s193_s14 = scalar_lea.sflag [#allocation4], %s555_s23 }
  0x2d   : > { %s181_s4 = scalar_lea.vmem %s602_s1, %s308_s29  ;;  %s400_s16 = sshra.s32 %s209_s13, 4  ;;  %s401_s16 = int_to_ptr.hbm [resolvable:$true] %s400_s16 }
  0x2e   : > { %v186_v1 = vld [vmem:[%s181_s4] sm:$0xff]  ;;  %v187_v5 = vld [vmem:[%s181_s4 + $0x8] sm:$0xff]  ;;  %s402_s17 = scalar_lea.hbm %s401_s16, 16  ;;  %s406_s25 = scalar_lea.hbm %s603_s2, 32 }
  0x2f   : > { %v188_v6 = vadd.f32 %v186_v1, %v184_v3  ;;  %v189_v7 = vadd.f32 %v187_v5, %v185_v4  ;;  %p403_p6 = scmp.ne.s32.totalorder %s401_s16, %s402_s17  ;;  %p407_p1 = scmp.lt.s32.totalorder %s401_s16, %s603_s2 }
  0x30   : > { %p408_p3 = scmp.lt.s32.totalorder %s406_s25, %s402_s17 }
  0x31   : > { %190 = vst [vmem:[%s176_s20] sm:$0xff] %v188_v6  ;;  %p404_p13 = pnand %p403_p6, %p519_p11 }
  0x32   : > { %191 = vst [vmem:[%s176_s20 + $0x8] sm:$0xff] %v189_v7  ;;  %p409_p4 = por %p408_p3, %p407_p1 }
  0x33   : > { %p405_p0 = pneg %p404_p13 }
  0x35   : > { %p410_p7 = pnand %p409_p4, %p405_p0 }
  0x37   : > { %413 = shalt.err (!%p410_p7)
}
  0x38   : > { %312 = dma.vmem_to_hbm [thread:$0]  (%p519_p11), %s207_s8, 256, %s209_s13, %s193_s14  }
  0x39 PF: > { %s220_s23 = sand.u32 1, %s440_s9   ;;  %p609_p5 = scmp.ge.s32.totalorder %s452_s12, 2 }
  0x3a   : > { %s221_s28 = scalar_lea.sflag [#allocation4], %s220_s23 }
  0x3b   : > { %p319_p8 = pnand %p609_p5, %p523_p12 }
  0x3d   : > { %p320_p10 = pneg %p319_p8 }
  0x3f   : > { %435 = dma.done.wait (%p320_p10), %s221_s28, 256  }
  0x40   : > { %437 = vsyncadd (%p320_p10), %s221_s28, 4294967040  ;;  %p15_p2 = scmp.ge.s32.totalorder %s494_s15, 4   ;;  %s610_s9 = smov %s444_s10 }
  0x41   : > { %s611_s10 = smov %s448_s11  ;;  %s612_s11 = smov %s506_s18 }
  0x42   : > { %s613_s12 = smov %s494_s15  ;;  %17 = sbr.rel (!%p15_p2) target bundleno = 5 (0x5), region = 76 }
  0x47   :  { %227 = vsyncpa [#allocation3], 1 }
  0x48   :  { %229 = vsyncpa [#allocation3 + $0x1], 1 }
  0x49   :  { %230 = vsyncpa [#allocation4], 1 }
  0x4a   :  { %232 = vsyncpa [#allocation4 + $0x1], 1 }

</bundles_post_ra>
